<compile_context>
chip_gen: v6e
topology: v6e:2x2x1
jax: 0.10.0
libtpu: 0.0.40
codegen_flags: <defaults>
</compile_context>

<pallas_src>
import jax
import jax.numpy as jnp
from jax.experimental import pallas as pl
from jax.experimental.pallas import tpu as pltpu

K_IN = 7
N_OUT = 2
H1, H2, H3 = 128, 128, 64
DEFAULT_TILE_B = 4096   # multiple of 8; fits VMEM easily (~3 MB of temps)


def _round_up(n, m):
    return ((n + m - 1) // m) * m


def _pick_tile_b(B, max_tile):
    tb = min(max_tile, _round_up(max(B, 1), 8))
    # v7x has 2 TensorCores: once the batch is big enough, make sure the grid
    # has >= 2 steps so the "parallel" axis can actually be sharded.
    if B >= 1024 and (B + tb - 1) // tb < 2:
        tb = _round_up((B + 1) // 2, 8)
    return tb


def _mlp_kernel(x_ref,
                w1_ref, b1_ref,
                w2_ref, b2_ref,
                w3_ref, b3_ref,
                w4_ref, b4_ref,
                o_ref):
    # x tile is f32 (tile_b, 7); cast to bf16 in-kernel (no wrapper pad/cast
    # pass).  All dots accumulate in f32 on the MXU; bias add / ReLU in f32.
    x = x_ref[...].astype(jnp.bfloat16)

    # fc1 + ReLU  (K=7 contraction; Mosaic pads internally)
    h = jnp.dot(x, w1_ref[...], preferred_element_type=jnp.float32) + b1_ref[...]
    h = jnp.maximum(h, 0.0).astype(jnp.bfloat16)

    # fc2 + ReLU
    h = jnp.dot(h, w2_ref[...], preferred_element_type=jnp.float32) + b2_ref[...]
    h = jnp.maximum(h, 0.0).astype(jnp.bfloat16)

    # fc3 + ReLU
    h = jnp.dot(h, w3_ref[...], preferred_element_type=jnp.float32) + b3_ref[...]
    h = jnp.maximum(h, 0.0).astype(jnp.bfloat16)

    # fc4 (no activation); store only the 2 real output columns.
    o_ref[...] = (
        jnp.dot(h, w4_ref[...], preferred_element_type=jnp.float32) + b4_ref[...]
    )


def mlp_forward(x, params, tile_b=DEFAULT_TILE_B):
    """x: (B, 7) float32.  params: dict of (in,out) f32 weights, (1,out) f32 biases."""
    B = x.shape[0]
    tb = _pick_tile_b(B, tile_b)
    grid = (pl.cdiv(B, tb),)

    # Weights pre-transposed (in, out), bf16 for the MXU.  No padding of K=7 /
    # N=2 / N=64 -- zero FLOPs padding doesn't reduce vmatmul count.
    w1 = params["w1"].astype(jnp.bfloat16)   # (7, 128)
    w2 = params["w2"].astype(jnp.bfloat16)   # (128, 128)
    w3 = params["w3"].astype(jnp.bfloat16)   # (128, 64)
    w4 = params["w4"].astype(jnp.bfloat16)   # (64, 2)

    # Biases stay f32 (added to f32 accumulators).
    b1 = params["b1"]   # (1, 128)
    b2 = params["b2"]   # (1, 128)
    b3 = params["b3"]   # (1, 64)
    b4 = params["b4"]   # (1, 2)

    # Constant index_map -> weights/biases stay resident in VMEM across steps.
    def resident(a):
        return pl.BlockSpec(a.shape, lambda i: (0,) * a.ndim)

    flops = 2 * B * (K_IN * H1 + H1 * H2 + H2 * H3 + H3 * N_OUT)
    weight_bytes = 2 * (K_IN * H1 + H1 * H2 + H2 * H3 + H3 * N_OUT)
    bias_bytes = 4 * (H1 + H2 + H3 + N_OUT)
    bytes_accessed = B * K_IN * 4 + B * N_OUT * 4 + weight_bytes + bias_bytes

    out = pl.pallas_call(
        _mlp_kernel,
        out_shape=jax.ShapeDtypeStruct((B, N_OUT), jnp.float32),
        grid=grid,
        in_specs=[
            pl.BlockSpec((tb, K_IN), lambda i: (i, 0)),   # x tile (last dim = full 7)
            resident(w1), resident(b1),
            resident(w2), resident(b2),
            resident(w3), resident(b3),
            resident(w4), resident(b4),
        ],
        out_specs=pl.BlockSpec((tb, N_OUT), lambda i: (i, 0)),  # last dim = full 2
        compiler_params=pltpu.CompilerParams(
            dimension_semantics=("parallel",)),
        cost_estimate=pl.CostEstimate(
            flops=flops, transcendentals=0, bytes_accessed=bytes_accessed),
    )(x, w1, b1, w2, b2, w3, b3, w4, b4)

    return out


def init_params(key):
    """Deterministic init mimicking torch.nn.Linear default (uniform +-1/sqrt(fan_in)).
    Weights are stored as (in_features, out_features) = W.T relative to PyTorch."""
    sizes = [(K_IN, H1), (H1, H2), (H2, H3), (H3, N_OUT)]
    params = {}
    for i, (fin, fout) in enumerate(sizes, start=1):
        key, kw, kb = jax.random.split(key, 3)
        bound = 1.0 / jnp.sqrt(jnp.float32(fin))
        params[f"w{i}"] = jax.random.uniform(
            kw, (fin, fout), jnp.float32, minval=-bound, maxval=bound)
        params[f"b{i}"] = jax.random.uniform(
            kb, (1, fout), jnp.float32, minval=-bound, maxval=bound)
    return params


def reference_forward(x, params):
    h = jnp.maximum(x @ params["w1"] + params["b1"], 0.0)
    h = jnp.maximum(h @ params["w2"] + params["b2"], 0.0)
    h = jnp.maximum(h @ params["w3"] + params["b3"], 0.0)
    return h @ params["w4"] + params["b4"]


if __name__ == "__main__":
    key = jax.random.PRNGKey(0)
    key, kx = jax.random.split(key)
    params = init_params(key)

    # Small exact-tile batch, plus a batch that exercises the partial edge block
    # (dropped writes) path.
    for B in (8, 300):
        x = jax.random.normal(jax.random.fold_in(kx, B), (B, K_IN), jnp.float32)
        out = jax.block_until_ready(mlp_forward(x, params))
        ref = reference_forward(x, params)  # full-f32 reference
        assert out.shape == (B, N_OUT), out.shape
        # bf16 matmul inputs (f32 accumulation) -> loosened tolerance vs. f32 ref.
        assert jnp.allclose(out, ref, atol=5e-2, rtol=5e-2), f"mismatch at B={B}"

    print("KERNEL_OK")
</pallas_src>

<mosaic_0001>
module attributes {stable_mosaic.version = 11 : i64} {
  func.func @_mlp_kernel(%arg0: i32, %arg1: memref<8x7xf32, #tpu.memory_space<vmem>>, %arg2: memref<7x128xbf16, #tpu.memory_space<vmem>>, %arg3: memref<1x128xf32, #tpu.memory_space<vmem>>, %arg4: memref<128x128xbf16, #tpu.memory_space<vmem>>, %arg5: memref<1x128xf32, #tpu.memory_space<vmem>>, %arg6: memref<128x64xbf16, #tpu.memory_space<vmem>>, %arg7: memref<1x64xf32, #tpu.memory_space<vmem>>, %arg8: memref<64x2xbf16, #tpu.memory_space<vmem>>, %arg9: memref<1x2xf32, #tpu.memory_space<vmem>>, %arg10: memref<8x2xf32, #tpu.memory_space<vmem>>) attributes {dimension_semantics = [#tpu.dimension_semantics<parallel>], iteration_bounds = array<i64: 1>, scalar_prefetch = 0 : i64, scratch_operands = 0 : i64, tpu.core_type = #tpu.core_type<tc>, window_params = [{transform_indices = @transform_0, window_bounds = array<i64: 8, 7>}, {pipeline_mode = #tpu.pipeline_mode<synchronous>, transform_indices = @transform_1, window_bounds = array<i64: 7, 128>}, {pipeline_mode = #tpu.pipeline_mode<synchronous>, transform_indices = @transform_2, window_bounds = array<i64: 1, 128>}, {pipeline_mode = #tpu.pipeline_mode<synchronous>, transform_indices = @transform_3, window_bounds = array<i64: 128, 128>}, {pipeline_mode = #tpu.pipeline_mode<synchronous>, transform_indices = @transform_4, window_bounds = array<i64: 1, 128>}, {pipeline_mode = #tpu.pipeline_mode<synchronous>, transform_indices = @transform_5, window_bounds = array<i64: 128, 64>}, {pipeline_mode = #tpu.pipeline_mode<synchronous>, transform_indices = @transform_6, window_bounds = array<i64: 1, 64>}, {pipeline_mode = #tpu.pipeline_mode<synchronous>, transform_indices = @transform_7, window_bounds = array<i64: 64, 2>}, {pipeline_mode = #tpu.pipeline_mode<synchronous>, transform_indices = @transform_8, window_bounds = array<i64: 1, 2>}, {transform_indices = @transform_9, window_bounds = array<i64: 8, 2>}]} {
    %c0 = arith.constant 0 : index
    %c0_0 = arith.constant 0 : index
    %0 = vector.load %arg1[%c0, %c0_0] : memref<8x7xf32, #tpu.memory_space<vmem>>, vector<8x7xf32>
    %1 = arith.truncf %0 : vector<8x7xf32> to vector<8x7xbf16>
    %c0_1 = arith.constant 0 : index
    %c0_2 = arith.constant 0 : index
    %2 = vector.load %arg2[%c0_1, %c0_2] : memref<7x128xbf16, #tpu.memory_space<vmem>>, vector<7x128xbf16>
    %cst = arith.constant dense<0.000000e+00> : vector<8x128xf32>
    %3 = tpu.matmul %1, %2, %cst {dimension_numbers = #tpu.dot_dimension_numbers<[1], [0], [0], [1], [0, 0, 1, 1], [], []>} : vector<8x7xbf16>, vector<7x128xbf16>, vector<8x128xf32> -> vector<8x128xf32>
    %c0_3 = arith.constant 0 : index
    %c0_4 = arith.constant 0 : index
    %4 = vector.load %arg3[%c0_3, %c0_4] : memref<1x128xf32, #tpu.memory_space<vmem>>, vector<1x128xf32>
    %5 = vector.broadcast %4 : vector<1x128xf32> to vector<8x128xf32>
    %6 = arith.addf %3, %5 : vector<8x128xf32>
    %cst_5 = arith.constant 0.000000e+00 : f32
    %7 = vector.broadcast %cst_5 : f32 to vector<8x128xf32>
    %8 = arith.maximumf %6, %7 : vector<8x128xf32>
    %9 = arith.truncf %8 : vector<8x128xf32> to vector<8x128xbf16>
    %c0_6 = arith.constant 0 : index
    %c0_7 = arith.constant 0 : index
    %10 = vector.load %arg4[%c0_6, %c0_7] : memref<128x128xbf16, #tpu.memory_space<vmem>>, vector<128x128xbf16>
    %cst_8 = arith.constant dense<0.000000e+00> : vector<8x128xf32>
    %11 = tpu.matmul %9, %10, %cst_8 {dimension_numbers = #tpu.dot_dimension_numbers<[1], [0], [0], [1], [0, 0, 1, 1], [], []>} : vector<8x128xbf16>, vector<128x128xbf16>, vector<8x128xf32> -> vector<8x128xf32>
    %c0_9 = arith.constant 0 : index
    %c0_10 = arith.constant 0 : index
    %12 = vector.load %arg5[%c0_9, %c0_10] : memref<1x128xf32, #tpu.memory_space<vmem>>, vector<1x128xf32>
    %13 = vector.broadcast %12 : vector<1x128xf32> to vector<8x128xf32>
    %14 = arith.addf %11, %13 : vector<8x128xf32>
    %cst_11 = arith.constant 0.000000e+00 : f32
    %15 = vector.broadcast %cst_11 : f32 to vector<8x128xf32>
    %16 = arith.maximumf %14, %15 : vector<8x128xf32>
    %17 = arith.truncf %16 : vector<8x128xf32> to vector<8x128xbf16>
    %c0_12 = arith.constant 0 : index
    %c0_13 = arith.constant 0 : index
    %18 = vector.load %arg6[%c0_12, %c0_13] : memref<128x64xbf16, #tpu.memory_space<vmem>>, vector<128x64xbf16>
    %cst_14 = arith.constant dense<0.000000e+00> : vector<8x64xf32>
    %19 = tpu.matmul %17, %18, %cst_14 {dimension_numbers = #tpu.dot_dimension_numbers<[1], [0], [0], [1], [0, 0, 1, 1], [], []>} : vector<8x128xbf16>, vector<128x64xbf16>, vector<8x64xf32> -> vector<8x64xf32>
    %c0_15 = arith.constant 0 : index
    %c0_16 = arith.constant 0 : index
    %20 = vector.load %arg7[%c0_15, %c0_16] : memref<1x64xf32, #tpu.memory_space<vmem>>, vector<1x64xf32>
    %21 = vector.broadcast %20 : vector<1x64xf32> to vector<8x64xf32>
    %22 = arith.addf %19, %21 : vector<8x64xf32>
    %cst_17 = arith.constant 0.000000e+00 : f32
    %23 = vector.broadcast %cst_17 : f32 to vector<8x64xf32>
    %24 = arith.maximumf %22, %23 : vector<8x64xf32>
    %25 = arith.truncf %24 : vector<8x64xf32> to vector<8x64xbf16>
    %c0_18 = arith.constant 0 : index
    %c0_19 = arith.constant 0 : index
    %26 = vector.load %arg8[%c0_18, %c0_19] : memref<64x2xbf16, #tpu.memory_space<vmem>>, vector<64x2xbf16>
    %cst_20 = arith.constant dense<0.000000e+00> : vector<8x2xf32>
    %27 = tpu.matmul %25, %26, %cst_20 {dimension_numbers = #tpu.dot_dimension_numbers<[1], [0], [0], [1], [0, 0, 1, 1], [], []>} : vector<8x64xbf16>, vector<64x2xbf16>, vector<8x2xf32> -> vector<8x2xf32>
    %c0_21 = arith.constant 0 : index
    %c0_22 = arith.constant 0 : index
    %28 = vector.load %arg9[%c0_21, %c0_22] : memref<1x2xf32, #tpu.memory_space<vmem>>, vector<1x2xf32>
    %29 = vector.broadcast %28 : vector<1x2xf32> to vector<8x2xf32>
    %30 = arith.addf %27, %29 : vector<8x2xf32>
    %c0_23 = arith.constant 0 : index
    %c0_24 = arith.constant 0 : index
    %31 = vector.load %arg10[%c0_23, %c0_24] : memref<8x2xf32, #tpu.memory_space<vmem>>, vector<8x2xf32>
    tpu.vector_store %arg10[%c0_23, %c0_24], %30 {strides = array<i32>} : memref<8x2xf32, #tpu.memory_space<vmem>>, vector<8x2xf32>,
    return
  }
  func.func @transform_0(%arg0: i32) -> (i32, i32) {
    %c0_i32 = arith.constant 0 : i32
    %c0_i32_0 = arith.constant 0 : i32
    return %arg0, %c0_i32 : i32, i32
  }
  func.func @transform_1(%arg0: i32) -> (i32, i32) {
    %c0_i32 = arith.constant 0 : i32
    %c0_i32_0 = arith.constant 0 : i32
    %c0_i32_1 = arith.constant 0 : i32
    return %c0_i32, %c0_i32_0 : i32, i32
  }
  func.func @transform_2(%arg0: i32) -> (i32, i32) {
    %c0_i32 = arith.constant 0 : i32
    %c0_i32_0 = arith.constant 0 : i32
    %c0_i32_1 = arith.constant 0 : i32
    return %c0_i32, %c0_i32_0 : i32, i32
  }
  func.func @transform_3(%arg0: i32) -> (i32, i32) {
    %c0_i32 = arith.constant 0 : i32
    %c0_i32_0 = arith.constant 0 : i32
    %c0_i32_1 = arith.constant 0 : i32
    return %c0_i32, %c0_i32_0 : i32, i32
  }
  func.func @transform_4(%arg0: i32) -> (i32, i32) {
    %c0_i32 = arith.constant 0 : i32
    %c0_i32_0 = arith.constant 0 : i32
    %c0_i32_1 = arith.constant 0 : i32
    return %c0_i32, %c0_i32_0 : i32, i32
  }
  func.func @transform_5(%arg0: i32) -> (i32, i32) {
    %c0_i32 = arith.constant 0 : i32
    %c0_i32_0 = arith.constant 0 : i32
    %c0_i32_1 = arith.constant 0 : i32
    return %c0_i32, %c0_i32_0 : i32, i32
  }
  func.func @transform_6(%arg0: i32) -> (i32, i32) {
    %c0_i32 = arith.constant 0 : i32
    %c0_i32_0 = arith.constant 0 : i32
    %c0_i32_1 = arith.constant 0 : i32
    return %c0_i32, %c0_i32_0 : i32, i32
  }
  func.func @transform_7(%arg0: i32) -> (i32, i32) {
    %c0_i32 = arith.constant 0 : i32
    %c0_i32_0 = arith.constant 0 : i32
    %c0_i32_1 = arith.constant 0 : i32
    return %c0_i32, %c0_i32_0 : i32, i32
  }
  func.func @transform_8(%arg0: i32) -> (i32, i32) {
    %c0_i32 = arith.constant 0 : i32
    %c0_i32_0 = arith.constant 0 : i32
    %c0_i32_1 = arith.constant 0 : i32
    return %c0_i32, %c0_i32_0 : i32, i32
  }
  func.func @transform_9(%arg0: i32) -> (i32, i32) {
    %c0_i32 = arith.constant 0 : i32
    %c0_i32_0 = arith.constant 0 : i32
    return %arg0, %c0_i32 : i32, i32
  }
}

</mosaic_0001>

<bundles_post_ra>
// kernel: tpu_custom_call.1
= control target key start
LH: loop header
LB: loop body
LE: loop exit
PB: predicated region body
PF: predicated region fallthrough
CT: control target
= control target key end

     0   :  { %vm47_vm0 = vcmask 1042432   ;;  %vm48_vm1 = vcmask 1043456   ;;  %v543_v0 = vmov 0.0   ;;  %v544_v2 = vmov 65535   ;;  %s706_s1 = inlined_call_operand.vmem [shape: bf16[7,128], index: 1, kind: input, shape index: {}]   ;;  %s707_s0 = inlined_call_operand.vmem [shape: f32[8,7], index: 0, kind: input, shape index: {}]   ;;  %s708_s3 = inlined_call_operand.vmem [shape: bf16[128,128], index: 3, kind: input, shape index: {}]   ;;  %s709_s5 = inlined_call_operand.vmem [shape: bf16[128,64], index: 5, kind: input, shape index: {}]   ;;  %s710_s2 = inlined_call_operand.vmem [shape: f32[1,128], index: 2, kind: input, shape index: {}]   ;;  %s711_s7 = inlined_call_operand.vmem [shape: bf16[64,2], index: 7, kind: input, shape index: {}]   ;;  %s712_s4 = inlined_call_operand.vmem [shape: f32[1,128], index: 4, kind: input, shape index: {}]   ;;  %s713_s6 = inlined_call_operand.vmem [shape: f32[1,64], index: 6, kind: input, shape index: {}]   ;;  %s714_s8 = inlined_call_operand.vmem [shape: f32[1,2], index: 8, kind: input, shape index: {}]   ;;  %s715_s9 = inlined_call_operand.vmem [shape: f32[8,2], index: 9, kind: output, shape index: {}]  }
   0x1   :  { %462 = vmatprep.subr.bf16.mxu0 %v543_v0  ;;  %v35_v1 = vld [vmem:[%s706_s1] sm:$0xf]  ;;  %v49_v3 = vsel %vm47_vm0, 4294967295, %v544_v2  ;;  %468 = vmatprep.subr.bf16.mxu1 %v543_v0  ;;  %vm545_vm2 = vmmov 0   ;;  %v523_v6 = vld [vmem:[%s708_s3 + $0x38] sm:$0xff]   ;;  %v524_v9 = vld [vmem:[%s708_s3 + $0x30] sm:$0xff]  }
   0x2   :  { %v33_v4 = vld [vmem:[%s707_s0] sm:$0xff]  ;;  %v50_v5 = vsel %vm48_vm1, %v49_v3, 0  ;;  %464 = vmatprep.mubr.msk.bf16.mxu0 %vm545_vm2, %v543_v0  ;;  %484 = vmatprep.mubr.msk.bf16.mxu1 %vm545_vm2, %v543_v0  ;;  %vm43_vm3 = vcmask 56320   ;;  %v525_v10 = vld [vmem:[%s708_s3 + $0x28] sm:$0xff]   ;;  %v527_v12 = vld [vmem:[%s708_s3 + $0x18] sm:$0xff]   ;;  %vm361_vm4 = vcmask 523264  }
   0x3   :  { %v52_v7 = vand.u32 %v50_v5, %v35_v1  ;;  %v34_v8 = vpack.c.bf16 %v33_v4, %v33_v4  ;;  %469 = vmatpush3.bf16.msra.mxu1 %v523_v6  ;;  %v526_v11 = vld [vmem:[%s708_s3 + $0x20] sm:$0xff]   ;;  %v528_v13 = vld [vmem:[%s708_s3 + $0x10] sm:$0xff]   ;;  %v529_v14 = vld [vmem:[%s708_s3 + $0x8] sm:$0xff]   ;;  %vm405_vm5 = vcmask 15360  }
   0x4   :  { %470 = vmatprep.subr.bf16.mxu1 %v543_v0  ;;  %v530_v15 = vld [vmem:[%s708_s3] sm:$0xff]   ;;  %v531_v16 = vld [vmem:[%s709_s5 + $0x38] sm:$0xff]   ;;  %v532_v17 = vld [vmem:[%s709_s5 + $0x30] sm:$0xff]  }
   0x5   :  { %463 = vmatpush3.bf16.msra.mxu0 %v52_v7  ;;  %v533_v18 = vld [vmem:[%s709_s5 + $0x28] sm:$0xff]   ;;  %v534_v19 = vld [vmem:[%s709_s5 + $0x20] sm:$0xff]   ;;  %v535_v20 = vld [vmem:[%s709_s5 + $0x18] sm:$0xff]  }
   0x6   :  { %488 = vmatprep.subr.bf16.mxu0 %v543_v0  ;;  %v536_v21 = vld [vmem:[%s709_s5 + $0x10] sm:$0xff]   ;;  %v411_v22 = vld [vmem:[%s710_s2] ss:$0 sm:$0xff]  ;;  %v537_v30 = vld [vmem:[%s709_s5 + $0x8] sm:$0xff]  }
   0x7   :  { %471 = vmatpush3.bf16.msra.mxu1 %v524_v9  ;;  %v538_v31 = vld [vmem:[%s709_s5] sm:$0xff]   ;;  %v539_v32 = vld [vmem:[%s711_s7 + $0x18] sm:$0xff]   ;;  %v540_v33 = vld [vmem:[%s711_s7 + $0x10] sm:$0xff]  }
   0x8   :  { %465 = vmatmul.mubr.msk.bf16.vlgmr.msra.gmra.mxu0 %vm43_vm3, %v34_v8  ;;  %472 = vmatprep.subr.bf16.mxu1 %v543_v0  ;;  %v413_v34 = vld [vmem:[%s712_s4] ss:$0 sm:$0xff]  ;;  %v541_v42 = vld [vmem:[%s711_s7 + $0x8] sm:$0xff]  }
   0x9   :  { %504 = vmatprep.mubr.msk.bf16.mxu0 %vm545_vm2, %v543_v0  ;;  %489 = vmatpush3.bf16.msra.mxu0 %v531_v16  ;;  %v542_v43 = vld [vmem:[%s711_s7] sm:$0xff]  }
   0xa   :  { %490 = vmatprep.subr.bf16.mxu0 %v543_v0  ;;  %v422_v44 = vld [vmem:[%s713_s6] ss:$0 sm:$0xff] }
   0xb   :  { %473 = vmatpush3.bf16.msra.mxu1 %v525_v10  ;;  %v431_v52 = vld [vmem:[%s714_s8] ss:$0 sm:$0xff] }
   0xc   :  { %474 = vmatprep.subr.bf16.mxu1 %v543_v0 }
   0xd   :  { %491 = vmatpush3.bf16.msra.mxu0 %v532_v17 }
   0xe   :  { %492 = vmatprep.subr.bf16.mxu0 %v543_v0 }
   0xf   :  { %475 = vmatpush3.bf16.msra.mxu1 %v526_v11 }
  0x10   :  { %476 = vmatprep.subr.bf16.mxu1 %v543_v0 }
  0x11   :  { %493 = vmatpush3.bf16.msra.mxu0 %v533_v18 }
  0x12   :  { %494 = vmatprep.subr.bf16.mxu0 %v543_v0 }
  0x13   :  { %477 = vmatpush3.bf16.msra.mxu1 %v527_v12 }
  0x14   :  { %478 = vmatprep.subr.bf16.mxu1 %v543_v0 }
  0x15   :  { %495 = vmatpush3.bf16.msra.mxu0 %v534_v19 }
  0x16   :  { %496 = vmatprep.subr.bf16.mxu0 %v543_v0 }
  0x17   :  { %479 = vmatpush3.bf16.msra.mxu1 %v528_v13 }
  0x18   :  { %480 = vmatprep.subr.bf16.mxu1 %v543_v0 }
  0x19   :  { %497 = vmatpush3.bf16.msra.mxu0 %v535_v20 }
  0x1a   :  { %498 = vmatprep.subr.bf16.mxu0 %v543_v0 }
  0x1b   :  { %481 = vmatpush3.bf16.msra.mxu1 %v529_v14 }
  0x1c   :  { %482 = vmatprep.subr.bf16.mxu1 %v543_v0 }
  0x1d   :  { %499 = vmatpush3.bf16.msra.mxu0 %v536_v21 }
  0x1e   :  { %500 = vmatprep.subr.bf16.mxu0 %v543_v0 }
  0x1f   :  { %483 = vmatpush3.bf16.msra.mxu1 %v530_v15 }
  0x20   :  { %508 = vmatprep.subr.bf16.mxu1 %v543_v0 }
  0x21   :  { %501 = vmatpush3.bf16.msra.mxu0 %v537_v30 }
  0x22   :  { %502 = vmatprep.subr.bf16.mxu0 %v543_v0 }
  0x25   :  { %503 = vmatpush3.bf16.msra.mxu0 %v538_v31 }
  0xc8   :  { %v88_v23 = vpop.f32.mrf.mxu0 }
  0xc9   :  { %v89_v24 = vadd.f32 %v411_v22, %v88_v23 }
  0xca   :  { %v466_v25 = vpop.f32.mrf.mxu0 }
  0xcb   :  { %v94_v26 = vmax.f32 %v89_v24, 0.0 }
  0xcc   :  { %v91_v27 = vpop.f32.mrf.mxu0 }
  0xcd   :  { %v95_v28 = vpack.c.bf16 %v94_v26, %v94_v26 }
  0xce   :  { %v467_v29 = vpop.f32.mrf.mxu0 }
  0xcf   :  { %485 = vmatmul.mubr.bf16.vlgmr.msra.gmra.mxu1 %v95_v28 }
  0xd0   :  { %516 = vmatprep.mubr.msk.bf16.mxu1 %vm545_vm2, %v543_v0  ;;  %509 = vmatpush3.bf16.msra.mxu1 %v539_v32 }
  0xd1   :  { %510 = vmatprep.subr.bf16.mxu1 %v543_v0 }
  0xd4   :  { %511 = vmatpush3.bf16.msra.mxu1 %v540_v33 }
  0xd5   :  { %512 = vmatprep.subr.bf16.mxu1 %v543_v0 }
  0xd8   :  { %513 = vmatpush3.bf16.msra.mxu1 %v541_v42 }
  0xd9   :  { %514 = vmatprep.subr.bf16.mxu1 %v543_v0 }
  0xdc   :  { %515 = vmatpush3.bf16.msra.mxu1 %v542_v43 }
 0x18f   :  { %v201_v35 = vpop.f32.mrf.mxu1 }
 0x190   :  { %v202_v36 = vadd.f32 %v413_v34, %v201_v35 }
 0x191   :  { %v486_v37 = vpop.f32.mrf.mxu1 }
 0x192   :  { %v207_v38 = vmax.f32 %v202_v36, 0.0 }
 0x193   :  { %v204_v39 = vpop.f32.mrf.mxu1 }
 0x194   :  { %v208_v40 = vpack.c.bf16 %v207_v38, %v207_v38 }
 0x195   :  { %v487_v41 = vpop.f32.mrf.mxu1 }
 0x196   :  { %505 = vmatmul.mubr.bf16.vlgmr.msra.gmra.mxu0 %v208_v40 }
 0x256   :  { %v314_v45 = vpop.f32.mrf.mxu0 }
 0x257   :  { %v315_v46 = vadd.f32 %v422_v44, %v314_v45 }
 0x258   :  { %v506_v47 = vpop.f32.mrf.mxu0 }
 0x259   :  { %v320_v48 = vmax.f32 %v315_v46, 0.0 }
 0x25a   :  { %v317_v49 = vpop.f32.mrf.mxu0 }
 0x25b   :  { %v321_v50 = vpack.c.bf16 %v320_v48, %v320_v48 }
 0x25c   :  { %v507_v51 = vpop.f32.mrf.mxu0 }
 0x25d   :  { %517 = vmatmul.mubr.msk.bf16.vlgmr.msra.gmra.mxu1 %vm361_vm4, %v321_v50 }
 0x31d   :  { %v399_v53 = vpop.f32.mrf.mxu1 }
 0x31e   :  { %v400_v54 = vadd.f32 %v431_v52, %v399_v53 }
 0x31f   :  { %v518_v55 = vpop.f32.mrf.mxu1 }
 0x320   :  { %406 = vst.msk [vmem:[%s715_s9] sm:$0xff] %vm405_vm5, %v400_v54 }
 0x321   :  { %v402_v56 = vpop.f32.mrf.mxu1 }
 0x323   :  { %v519_v57 = vpop.f32.mrf.mxu1 }

</bundles_post_ra>
